<compile_context>
chip_gen: v7x
topology: tpu7x:2x2x1
jax: 0.10.0
libtpu: 0.0.40
codegen_flags: <defaults>
</compile_context>

<pallas_src>
import functools

import jax
import jax.numpy as jnp
import numpy as np
from jax.experimental import pallas as pl
from jax.experimental.pallas import tpu as pltpu


def _shift_concat(a, top_mask, bot_mask):
    """Concatenate [row-1 | row | row+1] slabs along lanes (the matmul K axis).

    a        : (N*H, K) f32, images stacked along rows (H rows per image)
    top_mask : (N*H, 1) bool, True on the first row of each image
    bot_mask : (N*H, 1) bool, True on the last row of each image
    returns  : (N*H, 3K) f32 with per-image zero 'same' padding at the vertical borders
    """
    nh = a.shape[0]
    up = pltpu.roll(a, shift=1, axis=0)        # output row r reads input row r-1
    dn = pltpu.roll(a, shift=nh - 1, axis=0)   # == shift -1: output row r reads row r+1
    up = jnp.where(top_mask, 0.0, up)
    dn = jnp.where(bot_mask, 0.0, dn)
    return jnp.concatenate([up, a, dn], axis=1)


def bridge_kernel(x_ref, b1w_ref, b1b_ref, b2w_ref, b2b_ref, out_ref, *, H):
    """Whole Bridge (2x ConvBlock) in a single invocation, lane-dense layout.

    x_ref   : (N*H, W*Cin)        f32  images stacked along rows, channels-fastest
    b1w_ref : (3*W*Cin, W*Cout)   bf16 conv1 banded weights (taps stacked along K, BN folded)
    b1b_ref : (1, W*Cout)         f32  conv1 folded bias (lane-dense)
    b2w_ref : (3*W*Cout, W*Cout)  bf16 conv2 banded weights
    b2b_ref : (1, W*Cout)         f32  conv2 folded bias
    out_ref : (N*H, W*Cout)       f32  lane-dense output
    """
    nh = x_ref.shape[0]
    row = jax.lax.broadcasted_iota(jnp.int32, (nh, 1), 0)
    top = (row % H) == 0          # first row of each image
    bot = (row % H) == (H - 1)    # last row of each image

    # ---- ConvBlock 1: one MXU matmul, K = 3*W*Cin ----
    x1 = _shift_concat(x_ref[...], top, bot)
    acc1 = jnp.dot(x1.astype(jnp.bfloat16), b1w_ref[...],
                   preferred_element_type=jnp.float32)
    y1 = jnp.maximum(acc1 + b1b_ref[...], 0.0)          # folded BN + ReLU (f32)

    # ---- ConvBlock 2: one MXU matmul, K = 3*W*Cout ----
    x2 = _shift_concat(y1, top, bot)
    acc2 = jnp.dot(x2.astype(jnp.bfloat16), b2w_ref[...],
                   preferred_element_type=jnp.float32)
    out_ref[...] = jnp.maximum(acc2 + b2b_ref[...], 0.0)


def pack_convblock_params(w_hwio, sb, W):
    """Fold BN scale into the conv weights and pack them as ONE (3*W*Cin, W*Cout)
    block-banded matrix: vertical taps stacked along K (matching _shift_concat order
    [row-1 | row | row+1]); each tap block encodes the 3 horizontal taps, the channel
    mixing and the horizontal 'same' padding.  Run ONCE at setup.
    Returns (banded weights bf16, lane-dense bias (1, W*Cout) f32)."""
    kh, kw, Cin, Cout = w_hwio.shape
    scale, bias = sb[0], sb[1]
    ws = w_hwio.astype(jnp.float32) * scale[None, None, None, :]     # (3,3,Cin,Cout)

    j = jnp.arange(W)[:, None]        # input column index
    w = jnp.arange(W)[None, :]        # output column index
    dx = j - w + 1                    # horizontal tap index (pad=1)
    valid = (dx >= 0) & (dx < kw)
    dxc = jnp.clip(dx, 0, kw - 1)

    mats = []
    for dy in range(kh):
        bd = jnp.where(valid[:, :, None, None], ws[dy][dxc], 0.0)    # (W,W,Cin,Cout)
        mats.append(bd.transpose(0, 2, 1, 3).reshape(W * Cin, W * Cout))
    banded = jnp.concatenate(mats, axis=0).astype(jnp.bfloat16)      # (3*W*Cin, W*Cout)
    bias_dense = jnp.tile(bias, (W,)).reshape(1, W * Cout).astype(jnp.float32)
    return banded, bias_dense


@jax.jit
def bridge_forward_nhwc(x_nhwc, b1w, b1b, b2w, b2b):
    """Forward pass: takes pre-packed banded weights/biases (packed once at setup)."""
    N, H, W, Cin = x_nhwc.shape
    WCout = b1b.shape[-1]
    Cout = WCout // W
    x2d = x_nhwc.reshape(N * H, W * Cin).astype(jnp.float32)   # channels-fastest rows

    vmem = pl.BlockSpec(memory_space=pltpu.MemorySpace.VMEM)
    out2d = pl.pallas_call(
        functools.partial(bridge_kernel, H=H),
        out_shape=jax.ShapeDtypeStruct((N * H, WCout), jnp.float32),
        in_specs=[vmem, vmem, vmem, vmem, vmem],
        out_specs=vmem,
    )(x2d, b1w, b1b, b2w, b2b)

    return out2d.reshape(N, H, W, Cout)      # back to NHWC (metadata reshape)


def _make_convblock_params(key, cin, cout, eps=1e-5):
    """Deterministic Conv2d + BatchNorm2d (eval-mode) params, BN folded into scale/bias."""
    k_w, k_b, k_g, k_be, k_m, k_v = jax.random.split(key, 6)
    w = jax.random.normal(k_w, (3, 3, cin, cout), jnp.float32) * 0.1   # HWIO
    conv_b = jax.random.normal(k_b, (cout,), jnp.float32) * 0.1
    gamma = 1.0 + 0.1 * jax.random.normal(k_g, (cout,), jnp.float32)
    beta = 0.1 * jax.random.normal(k_be, (cout,), jnp.float32)
    r_mean = 0.1 * jax.random.normal(k_m, (cout,), jnp.float32)
    r_var = jax.random.uniform(k_v, (cout,), jnp.float32, 0.5, 1.5)
    scale = gamma / jnp.sqrt(r_var + eps)
    bias = (conv_b - r_mean) * scale + beta
    sb = jnp.stack([scale, bias], axis=0)   # (2, Cout)
    return w, sb


def _ref_convblock(x_nhwc, w, sb):
    y = jax.lax.conv_general_dilated(
        x_nhwc, w, window_strides=(1, 1), padding="SAME",
        dimension_numbers=("NHWC", "HWIO", "NHWC"))
    scale = sb[0].reshape(1, 1, 1, -1)
    bias = sb[1].reshape(1, 1, 1, -1)
    return jnp.maximum(y * scale + bias, 0.0)


if __name__ == "__main__":
    N, Cin, Cout, H, W = 2, 4, 8, 16, 16

    key = jax.random.PRNGKey(0)
    k_x, k_p1, k_p2 = jax.random.split(key, 3)

    # PyTorch-style NCHW input, transposed to NHWC for the kernel.
    x_nchw = jax.random.normal(k_x, (N, Cin, H, W), jnp.float32)
    x_nhwc = jnp.transpose(x_nchw, (0, 2, 3, 1))

    w1, sb1 = _make_convblock_params(k_p1, Cin, Cout)
    w2, sb2 = _make_convblock_params(k_p2, Cout, Cout)

    # One-time packing of the banded weights (hoisted out of the forward; review item 1).
    b1w, b1b = pack_convblock_params(w1, sb1, W)
    b2w, b2b = pack_convblock_params(w2, sb2, W)
    b1w, b1b, b2w, b2b = jax.block_until_ready((b1w, b1b, b2w, b2b))

    out = bridge_forward_nhwc(x_nhwc, b1w, b1b, b2w, b2b)
    out = jax.block_until_ready(out)

    # Pure-JAX f32 reference (same eval-mode BN folding).  Tolerance loosened for the
    # bf16 MXU operands (f32 accumulation keeps error well-behaved).
    ref = _ref_convblock(_ref_convblock(x_nhwc, w1, sb1), w2, sb2)
    np.testing.assert_allclose(np.asarray(out), np.asarray(ref), rtol=3e-2, atol=3e-2)

    print("KERNEL_OK")
</pallas_src>

<mosaic_0001>
module attributes {stable_mosaic.version = 11 : i64} {
  func.func @bridge_kernel(%arg0: memref<32x64xf32, #tpu.memory_space<vmem>>, %arg1: memref<192x128xbf16, #tpu.memory_space<vmem>>, %arg2: memref<1x128xf32, #tpu.memory_space<vmem>>, %arg3: memref<384x128xbf16, #tpu.memory_space<vmem>>, %arg4: memref<1x128xf32, #tpu.memory_space<vmem>>, %arg5: memref<32x128xf32, #tpu.memory_space<vmem>>) attributes {dimension_semantics = [], scalar_prefetch = 0 : i64, scratch_operands = 0 : i64, tpu.core_type = #tpu.core_type<tc>} {
    %0 = tpu.iota {dimensions = array<i32: 0>} : vector<32x1xi32>
    %c16_i32 = arith.constant 16 : i32
    %c0_i32 = arith.constant 0 : i32
    %1 = arith.cmpi eq, %c16_i32, %c0_i32 : i32
    %c1_i32 = arith.constant 1 : i32
    %2 = arith.select %1, %c1_i32, %c16_i32 : i32
    %3 = vector.broadcast %2 : i32 to vector<32x1xi32>
    %4 = arith.remsi %0, %3 : vector<32x1xi32>
    %c0_i32_0 = arith.constant 0 : i32
    %5 = vector.broadcast %c0_i32_0 : i32 to vector<32x1xi32>
    %6 = arith.cmpi ne, %4, %5 : vector<32x1xi32>
    %c0_i32_1 = arith.constant 0 : i32
    %7 = vector.broadcast %c0_i32_1 : i32 to vector<32x1xi32>
    %8 = arith.cmpi slt, %4, %7 : vector<32x1xi32>
    %c0_i32_2 = arith.constant 0 : i32
    %9 = arith.cmpi slt, %2, %c0_i32_2 : i32
    %10 = vector.broadcast %9 : i1 to vector<32x1xi1>
    %11 = vector.broadcast %10 : vector<32x1xi1> to vector<32x1xi1>
    %12 = arith.xori %8, %11 : vector<32x1xi1>
    %13 = arith.andi %12, %6 : vector<32x1xi1>
    %14 = vector.broadcast %2 : i32 to vector<32x1xi32>
    %15 = arith.addi %4, %14 : vector<32x1xi32>
    %16 = arith.select %13, %15, %4 : vector<32x1xi1>, vector<32x1xi32>
    %c0_i32_3 = arith.constant 0 : i32
    %17 = vector.broadcast %c0_i32_3 : i32 to vector<32x1xi32>
    %18 = arith.cmpi eq, %16, %17 : vector<32x1xi32>
    %c16_i32_4 = arith.constant 16 : i32
    %c0_i32_5 = arith.constant 0 : i32
    %19 = arith.cmpi eq, %c16_i32_4, %c0_i32_5 : i32
    %c1_i32_6 = arith.constant 1 : i32
    %20 = arith.select %19, %c1_i32_6, %c16_i32_4 : i32
    %21 = vector.broadcast %20 : i32 to vector<32x1xi32>
    %22 = arith.remsi %0, %21 : vector<32x1xi32>
    %c0_i32_7 = arith.constant 0 : i32
    %23 = vector.broadcast %c0_i32_7 : i32 to vector<32x1xi32>
    %24 = arith.cmpi ne, %22, %23 : vector<32x1xi32>
    %c0_i32_8 = arith.constant 0 : i32
    %25 = vector.broadcast %c0_i32_8 : i32 to vector<32x1xi32>
    %26 = arith.cmpi slt, %22, %25 : vector<32x1xi32>
    %c0_i32_9 = arith.constant 0 : i32
    %27 = arith.cmpi slt, %20, %c0_i32_9 : i32
    %28 = vector.broadcast %27 : i1 to vector<32x1xi1>
    %29 = vector.broadcast %28 : vector<32x1xi1> to vector<32x1xi1>
    %30 = arith.xori %26, %29 : vector<32x1xi1>
    %31 = arith.andi %30, %24 : vector<32x1xi1>
    %32 = vector.broadcast %20 : i32 to vector<32x1xi32>
    %33 = arith.addi %22, %32 : vector<32x1xi32>
    %34 = arith.select %31, %33, %22 : vector<32x1xi1>, vector<32x1xi32>
    %c15_i32 = arith.constant 15 : i32
    %35 = vector.broadcast %c15_i32 : i32 to vector<32x1xi32>
    %36 = arith.cmpi eq, %34, %35 : vector<32x1xi32>
    %c0 = arith.constant 0 : index
    %c0_10 = arith.constant 0 : index
    %37 = vector.load %arg0[%c0, %c0_10] : memref<32x64xf32, #tpu.memory_space<vmem>>, vector<32x64xf32>
    %c1_i32_11 = arith.constant 1 : i32
    %38 = tpu.dynamic_rotate %37 by %c1_i32_11 dim 0 : vector<32x64xf32>, i32 -> vector<32x64xf32>
    %c31_i32 = arith.constant 31 : i32
    %39 = tpu.dynamic_rotate %37 by %c31_i32 dim 0 : vector<32x64xf32>, i32 -> vector<32x64xf32>
    %cst = arith.constant 0.000000e+00 : f32
    %40 = vector.shape_cast %18 : vector<32x1xi1> to vector<32x1xi1>
    %41 = vector.broadcast %40 : vector<32x1xi1> to vector<32x64xi1>
    %42 = vector.broadcast %cst : f32 to vector<32x64xf32>
    %43 = arith.select %41, %42, %38 : vector<32x64xi1>, vector<32x64xf32>
    %cst_12 = arith.constant 0.000000e+00 : f32
    %44 = vector.shape_cast %36 : vector<32x1xi1> to vector<32x1xi1>
    %45 = vector.broadcast %44 : vector<32x1xi1> to vector<32x64xi1>
    %46 = vector.broadcast %cst_12 : f32 to vector<32x64xf32>
    %47 = arith.select %45, %46, %39 : vector<32x64xi1>, vector<32x64xf32>
    %48 = tpu.concatenate %43, %37, %47 in 1 : vector<32x64xf32>, vector<32x64xf32>, vector<32x64xf32> -> vector<32x192xf32>
    %49 = arith.truncf %48 : vector<32x192xf32> to vector<32x192xbf16>
    %c0_13 = arith.constant 0 : index
    %c0_14 = arith.constant 0 : index
    %50 = vector.load %arg1[%c0_13, %c0_14] : memref<192x128xbf16, #tpu.memory_space<vmem>>, vector<192x128xbf16>
    %cst_15 = arith.constant dense<0.000000e+00> : vector<32x128xf32>
    %51 = tpu.matmul %49, %50, %cst_15 {dimension_numbers = #tpu.dot_dimension_numbers<[1], [0], [0], [1], [0, 0, 1, 1], [], []>} : vector<32x192xbf16>, vector<192x128xbf16>, vector<32x128xf32> -> vector<32x128xf32>
    %c0_16 = arith.constant 0 : index
    %c0_17 = arith.constant 0 : index
    %52 = vector.load %arg2[%c0_16, %c0_17] : memref<1x128xf32, #tpu.memory_space<vmem>>, vector<1x128xf32>
    %53 = vector.broadcast %52 : vector<1x128xf32> to vector<32x128xf32>
    %54 = arith.addf %51, %53 : vector<32x128xf32>
    %cst_18 = arith.constant 0.000000e+00 : f32
    %55 = vector.broadcast %cst_18 : f32 to vector<32x128xf32>
    %56 = arith.maximumf %54, %55 : vector<32x128xf32>
    %c1_i32_19 = arith.constant 1 : i32
    %57 = tpu.dynamic_rotate %56 by %c1_i32_19 dim 0 : vector<32x128xf32>, i32 -> vector<32x128xf32>
    %c31_i32_20 = arith.constant 31 : i32
    %58 = tpu.dynamic_rotate %56 by %c31_i32_20 dim 0 : vector<32x128xf32>, i32 -> vector<32x128xf32>
    %cst_21 = arith.constant 0.000000e+00 : f32
    %59 = vector.shape_cast %18 : vector<32x1xi1> to vector<32x1xi1>
    %60 = vector.broadcast %59 : vector<32x1xi1> to vector<32x128xi1>
    %61 = vector.broadcast %cst_21 : f32 to vector<32x128xf32>
    %62 = arith.select %60, %61, %57 : vector<32x128xi1>, vector<32x128xf32>
    %cst_22 = arith.constant 0.000000e+00 : f32
    %63 = vector.shape_cast %36 : vector<32x1xi1> to vector<32x1xi1>
    %64 = vector.broadcast %63 : vector<32x1xi1> to vector<32x128xi1>
    %65 = vector.broadcast %cst_22 : f32 to vector<32x128xf32>
    %66 = arith.select %64, %65, %58 : vector<32x128xi1>, vector<32x128xf32>
    %67 = tpu.concatenate %62, %56, %66 in 1 : vector<32x128xf32>, vector<32x128xf32>, vector<32x128xf32> -> vector<32x384xf32>
    %68 = arith.truncf %67 : vector<32x384xf32> to vector<32x384xbf16>
    %c0_23 = arith.constant 0 : index
    %c0_24 = arith.constant 0 : index
    %69 = vector.load %arg3[%c0_23, %c0_24] : memref<384x128xbf16, #tpu.memory_space<vmem>>, vector<384x128xbf16>
    %cst_25 = arith.constant dense<0.000000e+00> : vector<32x128xf32>
    %70 = tpu.matmul %68, %69, %cst_25 {dimension_numbers = #tpu.dot_dimension_numbers<[1], [0], [0], [1], [0, 0, 1, 1], [], []>} : vector<32x384xbf16>, vector<384x128xbf16>, vector<32x128xf32> -> vector<32x128xf32>
    %c0_26 = arith.constant 0 : index
    %c0_27 = arith.constant 0 : index
    %71 = vector.load %arg4[%c0_26, %c0_27] : memref<1x128xf32, #tpu.memory_space<vmem>>, vector<1x128xf32>
    %72 = vector.broadcast %71 : vector<1x128xf32> to vector<32x128xf32>
    %73 = arith.addf %70, %72 : vector<32x128xf32>
    %cst_28 = arith.constant 0.000000e+00 : f32
    %74 = vector.broadcast %cst_28 : f32 to vector<32x128xf32>
    %75 = arith.maximumf %73, %74 : vector<32x128xf32>
    %c0_29 = arith.constant 0 : index
    %c0_30 = arith.constant 0 : index
    %76 = vector.load %arg5[%c0_29, %c0_30] : memref<32x128xf32, #tpu.memory_space<vmem>>, vector<32x128xf32>
    tpu.vector_store %arg5[%c0_29, %c0_30], %75 {strides = array<i32>} : memref<32x128xf32, #tpu.memory_space<vmem>>, vector<32x128xf32>,
    return
  }
}

</mosaic_0001>

<bundles_post_ra>
// kernel: bridge_forward_nhwc.1
= control target key start
LH: loop header
LB: loop body
LE: loop exit
PB: predicated region body
PF: predicated region fallthrough
CT: control target
= control target key end

     0   :  { %v817_v3 = vmov 0   ;;  %v21_v4 = vlaneseq  ;;  %s818_s28 = smov 64   ;;  %vm144_vm2 = vcmask 523264   ;;  %vm819_vm8 = vmmov 1   ;;  %s1088_s0 = inlined_call_operand.vmem [shape: f32[32,64], index: 0, kind: input, shape index: {}]   ;;  %s1089_s1 = inlined_call_operand.vmem [shape: bf16[192,128], index: 1, kind: input, shape index: {}]   ;;  %s1090_s3 = inlined_call_operand.vmem [shape: bf16[384,128], index: 3, kind: input, shape index: {}]   ;;  %s1091_s2 = inlined_call_operand.vmem [shape: f32[1,128], index: 2, kind: input, shape index: {}]   ;;  %s1092_s4 = inlined_call_operand.vmem [shape: f32[1,128], index: 4, kind: input, shape index: {}]   ;;  %s1093_s5 = inlined_call_operand.vmem [shape: f32[32,128], index: 5, kind: output, shape index: {}]  }
   0x1   :  { %v82_v0 = vld [vmem:[%s1088_s0] sm:$0xff]  ;;  %v83_v1 = vld [vmem:[%s1088_s0 + $0x8] sm:$0xff]  ;;  %v84_v2 = vld [vmem:[%s1088_s0 + $0x10] sm:$0xff]  ;;  %262 = vmatprep.subr.bf16.mxu0 %v817_v3 }
   0x2   :  { %v771_v5 = vpack.i.bf16 %v83_v1, %v82_v0  ;;  %v85_v6 = vld [vmem:[%s1088_s0 + $0x18] sm:$0xff]  ;;  %v781_v7 = vld [vmem:[%s1089_s1] sm:$0xff]   ;;  %v96_v8 = vrot.slane %v83_v1, 1  ;;  %v782_v11 = vld [vmem:[%s1089_s1 + $0x8] sm:$0xff]   ;;  %v869_v12 = vshrl.u32 %v21_v4, 7  ;;  %v95_v13 = vrot.slane %v82_v0, 1 }
   0x3   :  { %v98_v9 = vrot.slane %v85_v6, 1  ;;  %v776_v10 = vpack.i.bf16 %v85_v6, %v84_v2  ;;  %263 = vmatpush1.bf16.msra.mxu0 %v781_v7  ;;  %v97_v14 = vrot.slane %v84_v2, 1  ;;  %v783_v16 = vld [vmem:[%s1089_s1 + $0x10] sm:$0xff]   ;;  %v87_v20 = vrot.slane %v83_v1, 7  ;;  %v784_v28 = vld [vmem:[%s1089_s1 + $0x18] sm:$0xff]   ;;  %v785_v30 = vld [vmem:[%s1089_s1 + $0x20] sm:$0xff]  }
   0x4   :  { %772 = vrot.lane.b32.xlu0 %v771_v5, %s818_s28  ;;  %264 = vmatprep.subr.bf16.mxu0 %v817_v3  ;;  %v23_v15 = vadd.s32 8, %v869_v12  ;;  %vm99_vm0 = vcmp.lt.s32.totalorder %v869_v12, 7  ;;  %v86_v21 = vrot.slane %v82_v0, 7  ;;  %v89_v24 = vrot.slane %v85_v6, 7  ;;  %v793_v36 = vld [vmem:[%s1090_s3 + $0x40] sm:$0xff]   ;;  %v795_v39 = vld [vmem:[%s1090_s3 + $0x48] sm:$0xff]  }
   0x5   :  { %v101_v18 = vsel %vm99_vm0, %v96_v8, %v97_v14  ;;  %v100_v19 = vsel %vm99_vm0, %v97_v14, %v98_v9  ;;  %v102_v22 = vsel %vm99_vm0, %v95_v13, %v96_v8  ;;  %v103_v23 = vsel %vm99_vm0, %v98_v9, %v95_v13  ;;  %v794_v38 = vld [vmem:[%s1090_s3] sm:$0xff]   ;;  %710 = vmatprep.subr.bf16.mxu1 %v793_v36  ;;  %v796_v41 = vld [vmem:[%s1090_s3 + $0x8] sm:$0xff]   ;;  %v797_v43 = vld [vmem:[%s1090_s3 + $0x50] sm:$0xff]  }
   0x6   :  { %v37_v17 = vand.u32 15, %v23_v15  ;;  %v88_v26 = vrot.slane %v84_v2, 7  ;;  %vm90_vm3 = vcmp.lt.s32.totalorder %v869_v12, 1  ;;  %v25_v33 = vadd.s32 24, %v869_v12  ;;  %711 = vmatpush3.bf16.msra.mxu1 %v794_v38  ;;  %v786_v44 = vld [vmem:[%s1089_s1 + $0x28] sm:$0xff]   ;;  %v798_v46 = vld [vmem:[%s1090_s3 + $0x10] sm:$0xff]  }
   0x7   :  { %265 = vmatpush1.bf16.msra.mxu0 %v782_v11  ;;  %v93_v31 = vsel %vm90_vm3, %v86_v21, %v87_v20  ;;  %v94_v32 = vsel %vm90_vm3, %v89_v24, %v86_v21  ;;  %712 = vmatprep.subr.bf16.mxu1 %v795_v39  ;;  %v799_v47 = vld [vmem:[%s1090_s3 + $0x58] sm:$0xff]   ;;  %v787_v48 = vld [vmem:[%s1089_s1 + $0x30] sm:$0xff]   ;;  %v789_v50 = vld [vmem:[%s1089_s1 + $0x40] sm:$0xff]   ;;  %v30_v54 = vand.u32 15, %v869_v12  ;;  %v24_v55 = vadd.s32 16, %v869_v12 }
   0x8   :  { %777 = vrot.lane.b32.xlu0 %v776_v10, %s818_s28  ;;  %266 = vmatprep.subr.bf16.mxu0 %v817_v3  ;;  %vm886_vm1 = vcmp.eq.s32.totalorder %v37_v17, 15  ;;  %v908_v34 = vsel %vm90_vm3, %v88_v26, %v89_v24  ;;  %v912_v35 = vsel %vm90_vm3, %v87_v20, %v88_v26  ;;  %v51_v37 = vand.u32 15, %v25_v33  ;;  %v788_v49 = vld [vmem:[%s1089_s1 + $0x38] sm:$0xff]   ;;  %v790_v51 = vld [vmem:[%s1089_s1 + $0x48] sm:$0xff]   ;;  %v791_v52 = vld [vmem:[%s1089_s1 + $0x50] sm:$0xff]  }
   0x9   :  { %v125_v27 = vsel %vm886_vm1, 0.0, %v101_v18  ;;  %v792_v53 = vld [vmem:[%s1089_s1 + $0x58] sm:$0xff]   ;;  %vm972_vm5 = vcmp.eq.s32.totalorder %v30_v54, 0  ;;  %v44_v57 = vand.u32 15, %v24_v55  ;;  %v801_v10 = vld [vmem:[%s1090_s3 + $0x60] sm:$0xff]   ;;  %v803_v13 = vld [vmem:[%s1090_s3 + $0x68] sm:$0xff]  }
   0xa   :  { %v150_v29 = vpack.c.bf16 %v125_v27, %v102_v22  ;;  %vm924_vm4 = vcmp.eq.s32.totalorder %v51_v37, 15  ;;  %713 = vmatpush3.bf16.msra.mxu1 %v796_v41  ;;  %v112_v59 = vsel %vm972_vm5, 0.0, %v94_v32  ;;  %v800_v9 = vld [vmem:[%s1090_s3 + $0x18] sm:$0xff]   ;;  %v802_v11 = vld [vmem:[%s1090_s3 + $0x20] sm:$0xff]   ;;  %v804_v14 = vld [vmem:[%s1090_s3 + $0x28] sm:$0xff]  }
   0xb   :  { %267 = vmatpush1.bf16.msra.mxu0 %v783_v16  ;;  %v127_v42 = vsel %vm924_vm4, 0.0, %v103_v23  ;;  %714 = vmatprep.subr.bf16.mxu1 %v797_v43  ;;  %vm978_vm6 = vcmp.eq.s32.totalorder %v44_v57, 0  ;;  %v805_v15 = vld [vmem:[%s1090_s3 + $0x70] sm:$0xff]   ;;  %v807_v17 = vld [vmem:[%s1090_s3 + $0x78] sm:$0xff]   ;;  %v654_v20 = vld [vmem:[%s1091_s2] ss:$0 sm:$0xff] }
   0xc   :  { %268 = vmatprep.subr.bf16.mxu0 %v817_v3  ;;  %667 = vmatprep.mubr.msk.bf16.mxu0 %vm144_vm2, %v150_v29  ;;  %v152_v45 = vpack.c.bf16 %v127_v42, %v100_v19  ;;  %v806_v16 = vld [vmem:[%s1090_s3 + $0x30] sm:$0xff]   ;;  %v808_v18 = vld [vmem:[%s1090_s3 + $0x38] sm:$0xff]   ;;  %v809_v19 = vld [vmem:[%s1090_s3 + $0x80] sm:$0xff]  }
   0xd   :  { %vm694_vm7 = vmneg %vm972_vm5  ;;  %v812_v12 = vld [vmem:[%s1090_s3 + $0x98] sm:$0xff]   ;;  %v813_v62 = vld [vmem:[%s1090_s3 + $0xa0] sm:$0xff]  }
   0xe   :  { %715 = vmatpush3.bf16.msra.mxu1 %v798_v46  ;;  %vm695_vm9 = vmpackc.low %vm819_vm8, %vm694_vm7  ;;  %v814_v25 = vld [vmem:[%s1090_s3 + $0xa8] sm:$0xff]   ;;  %v669_v40 = vld [vmem:[%s1092_s4] ss:$0 sm:$0xff] }
   0xf   :  { %269 = vmatpush1.bf16.msra.mxu0 %v784_v28  ;;  %716 = vmatprep.subr.bf16.mxu1 %v799_v47  ;;  %vm698_vm10 = vmneg %vm978_vm6 }
  0x10   :  { %270 = vmatprep.subr.bf16.mxu0 %v817_v3  ;;  %vm702_vm11 = vmneg %vm886_vm1 }
  0x11   :  { %vm699_vm12 = vmpackc.low %vm819_vm8, %vm698_vm10 }
  0x12   :  { %717 = vmatpush3.bf16.msra.mxu1 %v800_v9  ;;  %vm703_vm13 = vmpackc.low %vm702_vm11, %vm819_vm8 }
  0x13   :  { %271 = vmatpush1.bf16.msra.mxu0 %v785_v30  ;;  %718 = vmatprep.subr.bf16.mxu1 %v801_v10  ;;  %vm706_vm14 = vmneg %vm924_vm4 }
  0x14   :  { %272 = vmatprep.subr.bf16.mxu0 %v817_v3  ;;  %vm707_vm15 = vmpackc.low %vm706_vm14, %vm819_vm8 }
  0x16   :  { %719 = vmatpush3.bf16.msra.mxu1 %v802_v11 }
  0x17   :  { %273 = vmatpush1.bf16.msra.mxu0 %v786_v44  ;;  %720 = vmatprep.subr.bf16.mxu1 %v803_v13 }
  0x18   :  { %274 = vmatprep.subr.bf16.mxu0 %v817_v3 }
  0x1a   :  { %721 = vmatpush3.bf16.msra.mxu1 %v804_v14 }
  0x1b   :  { %275 = vmatpush1.bf16.msra.mxu0 %v787_v48  ;;  %722 = vmatprep.subr.bf16.mxu1 %v805_v15 }
  0x1c   :  { %276 = vmatprep.subr.bf16.mxu0 %v817_v3 }
  0x1e   :  { %723 = vmatpush3.bf16.msra.mxu1 %v806_v16 }
  0x1f   :  { %277 = vmatpush1.bf16.msra.mxu0 %v788_v49  ;;  %724 = vmatprep.subr.bf16.mxu1 %v807_v17 }
  0x20   :  { %278 = vmatprep.subr.bf16.mxu0 %v817_v3 }
  0x22   :  { %725 = vmatpush3.bf16.msra.mxu1 %v808_v18 }
  0x23   :  { %279 = vmatpush1.bf16.msra.mxu0 %v789_v50  ;;  %748 = vmatprep.subr.bf16.mxu1 %v809_v19 }
  0x24   :  { %280 = vmatprep.subr.bf16.mxu0 %v817_v3 }
  0x27   :  { %281 = vmatpush1.bf16.msra.mxu0 %v790_v51 }
  0x28   :  { %282 = vmatprep.subr.bf16.mxu0 %v817_v3 }
  0x2b   :  { %283 = vmatpush1.bf16.msra.mxu0 %v791_v52 }
  0x2c   :  { %284 = vmatprep.subr.bf16.mxu0 %v817_v3  ;;  %v114_v3 = vsel %vm978_vm6, 0.0, %v912_v35 }
  0x2f   :  { %285 = vmatpush1.bf16.msra.mxu0 %v792_v53 }
  0x76   :  { %v773_v58 = vpop.permute.xlu0 %772 }
  0x77   :  { %v775_v60 = vunpack.i.h.bf16 %v773_v58  ;;  %v774_v61 = vunpack.i.l.bf16 %v773_v58 }
  0x79   :  { %v145_v63 = vsel %vm144_vm2, %v112_v59, %v774_v61  ;;  %v146_v0 = vsel %vm144_vm2, %v93_v31, %v775_v60  ;;  %v810_v59 = vld [vmem:[%s1090_s3 + $0x88] sm:$0xff]  }
  0x7a   :  { %v149_v1 = vpack.c.bf16 %v146_v0, %v145_v63  ;;  %v778_v2 = vpop.permute.xlu0 %777  ;;  %v811_v63 = vld [vmem:[%s1090_s3 + $0x90] sm:$0xff]  }
  0x7b   :  { %v780_v4 = vunpack.i.h.bf16 %v778_v2  ;;  %v779_v5 = vunpack.i.l.bf16 %v778_v2  ;;  %v815_v0 = vld [vmem:[%s1090_s3 + $0xb0] sm:$0xff]  }
  0x7c   :  { %295 = vmatmul.mubr.bf16.vlgmr.msra.gmra.mrb[0].mxu0 %v149_v1  ;;  %v816_v1 = vld [vmem:[%s1090_s3 + $0xb8] sm:$0xff]  }
  0x7d   :  { %668 = vmatprep.mubr.msk.bf16.mxu0 %vm144_vm2, %v152_v45  ;;  %v147_v6 = vsel %vm144_vm2, %v114_v3, %v779_v5  ;;  %v148_v7 = vsel %vm144_vm2, %v908_v34, %v780_v4 }
  0x7e   :  { %v151_v8 = vpack.c.bf16 %v148_v7, %v147_v6 }
  0x84   :  { %303 = vmatmul.mubr.bf16.gmra.mrb[4].mxu0 %v151_v8 }
 0x14f   :  { %v296_v21 = vpop.f32.mrb[0].mxu0 }
 0x150   :  { %v297_v22 = vadd.f32 %v654_v20, %v296_v21  ;;  %v298_v23 = vpop.f32.mrb[1].mxu0 }
 0x151   :  { %v299_v24 = vpop.f32.mrb[2].mxu0 }
 0x152   :  { %v311_v26 = vmax.f32 %v297_v22, 0.0  ;;  %v300_v27 = vadd.f32 %v654_v20, %v299_v24  ;;  %v301_v28 = vpop.f32.mrb[3].mxu0 }
 0x154   :  { %v312_v29 = vmax.f32 %v300_v27, 0.0  ;;  %v315_v30 = vrot.slane %v311_v26, 7  ;;  %v323_v31 = vrot.slane %v311_v26, 1 }
 0x156   :  { %v316_v32 = vrot.slane %v312_v29, 7  ;;  %v324_v33 = vrot.slane %v312_v29, 1  ;;  %v340_v34 = vpack.c.bf16 %v312_v29, %v311_v26 }
 0x157   :  { %v304_v35 = vpop.f32.mrb[4].mxu0 }
 0x158   :  { %v305_v36 = vadd.f32 %v654_v20, %v304_v35  ;;  %v306_v37 = vpop.f32.mrb[5].mxu0  ;;  %576 = vmatprep.mubr.bf16.mxu1 %v340_v34  ;;  %v321_v38 = vsel %vm90_vm3, %v315_v30, %v316_v32  ;;  %v329_v39 = vsel %vm99_vm0, %v323_v31, %v324_v33 }
 0x159   :  { %v307_v41 = vpop.f32.mrb[6].mxu0 }
 0x15a   :  { %v313_v42 = vmax.f32 %v305_v36, 0.0  ;;  %v308_v43 = vadd.f32 %v654_v20, %v307_v41  ;;  %v309_v44 = vpop.f32.mrb[7].mxu0 }
 0x15c   :  { %v317_v45 = vrot.slane %v313_v42, 7  ;;  %v325_v46 = vrot.slane %v313_v42, 1  ;;  %v314_v47 = vmax.f32 %v308_v43, 0.0 }
 0x15e   :  { %v318_v48 = vrot.slane %v314_v47, 7  ;;  %v326_v49 = vrot.slane %v314_v47, 1  ;;  %v343_v50 = vpack.c.bf16 %v314_v47, %v313_v42  ;;  %v320_v51 = vsel %vm90_vm3, %v316_v32, %v317_v45 }
 0x15f   :  { %v328_v52 = vsel %vm99_vm0, %v324_v33, %v325_v46 }
 0x160   :  { %v327_v53 = vsel %vm99_vm0, %v325_v46, %v326_v49  ;;  %v330_v54 = vsel %vm99_vm0, %v326_v49, %v323_v31  ;;  %v322_v55 = vsel %vm90_vm3, %v318_v48, %v315_v30  ;;  %v319_v56 = vsel %vm90_vm3, %v317_v45, %v318_v48 }
 0x161   :  { %v708_v57 = vpack.c.bf16 %v330_v54, %v327_v53  ;;  %v696_v58 = vpack.c.bf16 %v321_v38, %v322_v55  ;;  %v700_v60 = vpack.c.bf16 %v319_v56, %v320_v51  ;;  %v704_v61 = vpack.c.bf16 %v328_v52, %v329_v39 }
 0x163   :  { %697 = vmatmul.mubr.msk.bf16.vlgmr.msra.gmra.mrb[0].mxu1 %vm695_vm9, %v696_v58 }
 0x164   :  { %749 = vmatpush3.bf16.msra.mxu1 %v809_v19  ;;  %584 = vmatprep.mubr.bf16.mxu1 %v343_v50 }
 0x165   :  { %750 = vmatprep.subr.bf16.mxu1 %v810_v59 }
 0x168   :  { %751 = vmatpush3.bf16.msra.mxu1 %v810_v59 }
 0x169   :  { %752 = vmatprep.subr.bf16.mxu1 %v811_v63 }
 0x16b   :  { %701 = vmatmul.mubr.msk.bf16.gmra.mrb[4].mxu1 %vm699_vm12, %v700_v60 }
 0x16c   :  { %753 = vmatpush3.bf16.msra.mxu1 %v811_v63  ;;  %764 = vmatprep.mubr.msk.bf16.mxu1 %vm703_vm13, %v704_v61 }
 0x16d   :  { %754 = vmatprep.subr.bf16.mxu1 %v812_v12 }
 0x170   :  { %755 = vmatpush3.bf16.msra.mxu1 %v812_v12 }
 0x171   :  { %756 = vmatprep.subr.bf16.mxu1 %v813_v62 }
 0x174   :  { %757 = vmatpush3.bf16.msra.mxu1 %v813_v62 }
 0x175   :  { %758 = vmatprep.subr.bf16.mxu1 %v814_v25 }
 0x178   :  { %759 = vmatpush3.bf16.msra.mxu1 %v814_v25 }
 0x179   :  { %760 = vmatprep.subr.bf16.mxu1 %v815_v0 }
 0x17c   :  { %761 = vmatpush3.bf16.msra.mxu1 %v815_v0 }
 0x17d   :  { %762 = vmatprep.subr.bf16.mxu1 %v816_v1 }
 0x180   :  { %763 = vmatpush3.bf16.msra.mxu1 %v816_v1 }
 0x183   :  { %765 = vmatmul.mubr.msk.bf16.vlgmr.msra.gmra.mrb[8].mxu1 %vm707_vm15, %v708_v57 }
 0x236   :  { %v726_v2 = vpop.f32.mrb[0].mxu1 }
 0x237   :  { %v727_v3 = vpop.f32.mrb[1].mxu1 }
 0x238   :  { %v728_v4 = vadd.f32 %v727_v3, %v726_v2  ;;  %v729_v5 = vpop.f32.mrb[2].mxu1 }
 0x239   :  { %v730_v6 = vpop.f32.mrb[3].mxu1 }
 0x23a   :  { %v731_v7 = vadd.f32 %v730_v6, %v729_v5  ;;  %v579_v17 = vadd.f32 %v728_v4, %v669_v40 }
 0x23c   :  { %v582_v23 = vadd.f32 %v731_v7, %v669_v40 }
 0x23e   :  { %v732_v8 = vpop.f32.mrb[4].mxu1 }
 0x23f   :  { %v733_v9 = vpop.f32.mrb[5].mxu1 }
 0x240   :  { %v734_v10 = vadd.f32 %v733_v9, %v732_v8  ;;  %v735_v11 = vpop.f32.mrb[6].mxu1 }
 0x241   :  { %v736_v13 = vpop.f32.mrb[7].mxu1 }
 0x242   :  { %v737_v14 = vadd.f32 %v736_v13, %v735_v11  ;;  %v587_v15 = vadd.f32 %v734_v10, %v669_v40 }
 0x244   :  { %v590_v20 = vadd.f32 %v737_v14, %v669_v40 }
 0x256   :  { %v766_v16 = vpop.f32.mrb[8].mxu1 }
 0x257   :  { %v636_v18 = vadd.f32 %v766_v16, %v587_v15  ;;  %v627_v19 = vpop.f32.mrb[9].mxu1 }
 0x258   :  { %v628_v21 = vadd.f32 %v627_v19, %v579_v17  ;;  %v767_v22 = vpop.f32.mrb[10].mxu1 }
 0x259   :  { %v644_v24 = vmax.f32 %v636_v18, 0.0  ;;  %v639_v26 = vadd.f32 %v767_v22, %v590_v20  ;;  %v630_v27 = vpop.f32.mrb[11].mxu1 }
 0x25a   :  { %v642_v28 = vmax.f32 %v628_v21, 0.0  ;;  %v631_v29 = vadd.f32 %v630_v27, %v582_v23 }
 0x25b   :  { %648 = vst [vmem:[%s1093_s5 + $0x10] sm:$0xff] %v644_v24  ;;  %v645_v30 = vmax.f32 %v639_v26, 0.0 }
 0x25c   :  { %646 = vst [vmem:[%s1093_s5] sm:$0xff] %v642_v28  ;;  %v643_v31 = vmax.f32 %v631_v29, 0.0 }
 0x25d   :  { %649 = vst [vmem:[%s1093_s5 + $0x18] sm:$0xff] %v645_v30 }
 0x25e   :  { %647 = vst [vmem:[%s1093_s5 + $0x8] sm:$0xff] %v643_v31 }

</bundles_post_ra>
